<compile_context>
chip_gen: v6e
topology: v6e:2x2x1
jax: 0.10.0
libtpu: 0.0.40
codegen_flags: <defaults>
</compile_context>

<pallas_src>
import functools

import jax
import jax.numpy as jnp
from jax.experimental import pallas as pl
from jax.experimental.pallas import tpu as pltpu

ALPHA = 1.0
GAMMA = 2.0


def _round_up(x, m):
    return ((x + m - 1) // m) * m


def _choose_tile_n(n, c):
    """Batch tile: multiple of 32 rows, ~2 MiB of f32 compute per block.

    Capped by bytes (not a fixed row count) so small class counts still get
    large blocks, and clamped so tiny batches are not over-padded.
    """
    target_f32_bytes = 2 << 20
    rows = max(32, (target_f32_bytes // (c * 4)) // 32 * 32)
    return min(rows, _round_up(n, 32))


def _focal_loss_kernel(logits_ref, targets_ref, out_ref, *, alpha, gamma):
    # f32 compute everywhere (v5e has no bf16 VPU/EUP); DMA stays in input dtype.
    logits = logits_ref[...].astype(jnp.float32)        # (TILE_N, C)
    tgt = targets_ref[...]                              # (TILE_N, 1) int32
    tn, c = logits.shape

    # --- numerically-stable log-sum-exp per row ---
    row_max = jnp.max(logits, axis=-1, keepdims=True)                   # (TILE_N, 1)
    shifted = logits - row_max
    lse = jnp.log(jnp.sum(jnp.exp(shifted), axis=-1, keepdims=True)) + row_max

    # --- gather target logit via one-hot compare+select (VPU; keep off the MXU) ---
    col_ids = jax.lax.broadcasted_iota(jnp.int32, (tn, c), 1)
    tgt_logit = jnp.sum(jnp.where(col_ids == tgt, logits, 0.0),
                        axis=-1, keepdims=True)                          # (TILE_N, 1)

    ce = lse - tgt_logit                                                 # (TILE_N, 1)

    # --- focal weighting ---
    pt = jnp.exp(-ce)
    one_minus_pt = jnp.maximum(1.0 - pt, 0.0)   # clamp: ce ~ -eps would give pt > 1
    if gamma == 2.0:
        focal_w = one_minus_pt * one_minus_pt   # VALU square, no EUP pow
    elif gamma == 1.0:
        focal_w = one_minus_pt
    elif gamma == 0.0:
        focal_w = jnp.ones_like(one_minus_pt)
    else:
        focal_w = one_minus_pt ** gamma

    out_ref[...] = (alpha * focal_w * ce).astype(out_ref.dtype)          # (TILE_N, 1)


def focal_loss(logits, targets, *, alpha=ALPHA, gamma=GAMMA,
               reduction="mean", tile_n=None):
    """logits: (N, C) float (f32 or bf16); targets: (N,) int.

    Matches torch: ce = F.cross_entropy(..., reduction='none');
    focal = alpha * (1 - exp(-ce))**gamma * ce; then mean/sum/none.
    Out-of-range targets are treated as "no class" (tgt_logit = 0) rather than
    raising; scalar alpha only (matches the alpha=1 config of the module).
    """
    n, c = logits.shape
    targets2d = targets.reshape(n, 1).astype(jnp.int32)

    if tile_n is None:
        tile_n = _choose_tile_n(n, c)
    tile_n = max(32, (tile_n // 32) * 32)    # multiple of 32: covers bf16 packing

    n_pad = _round_up(n, tile_n)
    if n_pad != n:
        # Padded rows compute a finite (garbage) loss and are sliced off below.
        logits = jnp.pad(logits, ((0, n_pad - n), (0, 0)))
        targets2d = jnp.pad(targets2d, ((0, n_pad - n), (0, 0)))
    num_tiles = n_pad // tile_n

    kernel = functools.partial(
        _focal_loss_kernel, alpha=float(alpha), gamma=float(gamma))

    in_itemsize = jnp.dtype(logits.dtype).itemsize
    cost = pl.CostEstimate(
        flops=6 * n * c,
        transcendentals=n * c + 2 * n,               # exp over logits, exp(-ce), log
        bytes_accessed=n_pad * c * in_itemsize + n_pad * 4 + n_pad * 4,
    )

    per_row = pl.pallas_call(
        kernel,
        out_shape=jax.ShapeDtypeStruct((n_pad, 1), jnp.float32),
        grid_spec=pltpu.PrefetchScalarGridSpec(
            num_scalar_prefetch=0,
            grid=(num_tiles,),
            in_specs=[
                pl.BlockSpec((tile_n, c), lambda i: (i, 0)),
                pl.BlockSpec((tile_n, 1), lambda i: (i, 0)),
            ],
            out_specs=pl.BlockSpec((tile_n, 1), lambda i: (i, 0)),
        ),
        compiler_params=pltpu.CompilerParams(
            # every grid step owns its own output block -> fully parallel,
            # shards across both TensorCores on v7x
            dimension_semantics=("parallel",),
            vmem_limit_bytes=32 << 20,
        ),
        cost_estimate=cost,
    )(logits, targets2d)

    per_row = per_row[:n, 0]                 # drop padded rows (mask-free kernel)
    if reduction == "mean":
        return jnp.mean(per_row)
    elif reduction == "sum":
        return jnp.sum(per_row)
    else:
        return per_row


def _focal_loss_ref(logits, targets, alpha=ALPHA, gamma=GAMMA, reduction="mean"):
    """Pure-JAX reference mirroring torch F.cross_entropy + focal weighting."""
    logp = jax.nn.log_softmax(logits.astype(jnp.float32), axis=-1)
    ce = -jnp.take_along_axis(logp, targets[:, None], axis=-1)[:, 0]
    pt = jnp.exp(-ce)
    focal = alpha * (1.0 - pt) ** gamma * ce
    if reduction == "mean":
        return jnp.mean(focal)
    elif reduction == "sum":
        return jnp.sum(focal)
    return focal


if __name__ == "__main__":
    key = jax.random.PRNGKey(0)
    k_logits, k_targets = jax.random.split(key)

    N, C = 37, 16  # small; N not a multiple of 32 to exercise padding + slicing
    logits = jax.random.normal(k_logits, (N, C), dtype=jnp.float32)
    targets = jax.random.randint(k_targets, (N,), 0, C, dtype=jnp.int32)

    # f32, forced small tile -> multi-tile parallel grid (2 steps)
    ref = _focal_loss_ref(logits, targets)
    loss_multi = focal_loss(logits, targets, tile_n=32)
    jax.block_until_ready(loss_multi)
    assert jnp.allclose(loss_multi, ref, atol=1e-5, rtol=1e-5), (loss_multi, ref)

    # f32, default auto-tiled path (single tile)
    loss_auto = focal_loss(logits, targets)
    jax.block_until_ready(loss_auto)
    assert jnp.allclose(loss_auto, ref, atol=1e-5, rtol=1e-5), (loss_auto, ref)

    # bf16 streaming path: HBM/DMA in bf16, f32 compute in-kernel
    logits_bf16 = logits.astype(jnp.bfloat16)
    ref_bf16 = _focal_loss_ref(logits_bf16.astype(jnp.float32), targets)
    loss_bf16 = focal_loss(logits_bf16, targets)
    jax.block_until_ready(loss_bf16)
    assert jnp.allclose(loss_bf16, ref_bf16, atol=1e-4, rtol=1e-4), (loss_bf16, ref_bf16)

    # reduction='sum' path
    ref_sum = _focal_loss_ref(logits, targets, reduction="sum")
    loss_sum = focal_loss(logits, targets, reduction="sum")
    jax.block_until_ready(loss_sum)
    assert jnp.allclose(loss_sum, ref_sum, atol=1e-4, rtol=1e-5), (loss_sum, ref_sum)

    print("KERNEL_OK")
</pallas_src>

<mosaic_0001>
module attributes {stable_mosaic.version = 11 : i64} {
  func.func @_focal_loss_kernel(%arg0: i32, %arg1: memref<32x16xf32, #tpu.memory_space<vmem>>, %arg2: memref<32x1xi32, #tpu.memory_space<vmem>>, %arg3: memref<32x1xf32, #tpu.memory_space<vmem>>) attributes {dimension_semantics = [#tpu.dimension_semantics<parallel>], iteration_bounds = array<i64: 2>, scalar_prefetch = 0 : i64, scratch_operands = 0 : i64, tpu.core_type = #tpu.core_type<tc>, window_params = [{transform_indices = @transform_0, window_bounds = array<i64: 32, 16>}, {transform_indices = @transform_1, window_bounds = array<i64: 32, 1>}, {transform_indices = @transform_2, window_bounds = array<i64: 32, 1>}]} {
    %c0 = arith.constant 0 : index
    %c0_0 = arith.constant 0 : index
    %0 = vector.load %arg1[%c0, %c0_0] : memref<32x16xf32, #tpu.memory_space<vmem>>, vector<32x16xf32>
    %c0_1 = arith.constant 0 : index
    %c0_2 = arith.constant 0 : index
    %1 = vector.load %arg2[%c0_1, %c0_2] : memref<32x1xi32, #tpu.memory_space<vmem>>, vector<32x1xi32>
    %cst = arith.constant dense<0xFF800000> : vector<32xf32>
    %2 = vector.multi_reduction <maximumf>, %0, %cst [1] : vector<32x16xf32> to vector<32xf32>
    %3 = vector.shape_cast %2 : vector<32xf32> to vector<32x1xf32>
    %4 = vector.broadcast %3 : vector<32x1xf32> to vector<32x16xf32>
    %5 = arith.subf %0, %4 : vector<32x16xf32>
    %6 = math.exp %5 : vector<32x16xf32>
    %cst_3 = arith.constant dense<0.000000e+00> : vector<32xf32>
    %7 = vector.multi_reduction <add>, %6, %cst_3 [1] : vector<32x16xf32> to vector<32xf32>
    %8 = vector.shape_cast %7 : vector<32xf32> to vector<32x1xf32>
    %9 = math.log %8 : vector<32x1xf32>
    %10 = arith.addf %9, %3 : vector<32x1xf32>
    %11 = tpu.iota {dimensions = array<i32: 1>} : vector<32x16xi32>
    %12 = vector.broadcast %1 : vector<32x1xi32> to vector<32x16xi32>
    %13 = arith.cmpi eq, %11, %12 : vector<32x16xi32>
    %cst_4 = arith.constant 0.000000e+00 : f32
    %14 = vector.broadcast %cst_4 : f32 to vector<32x16xf32>
    %15 = arith.select %13, %0, %14 : vector<32x16xi1>, vector<32x16xf32>
    %cst_5 = arith.constant dense<0.000000e+00> : vector<32xf32>
    %16 = vector.multi_reduction <add>, %15, %cst_5 [1] : vector<32x16xf32> to vector<32xf32>
    %17 = vector.shape_cast %16 : vector<32xf32> to vector<32x1xf32>
    %18 = arith.subf %10, %17 : vector<32x1xf32>
    %cst_6 = arith.constant 0.000000e+00 : f32
    %19 = vector.broadcast %cst_6 : f32 to vector<32x1xf32>
    %20 = arith.subf %19, %18 : vector<32x1xf32>
    %21 = math.exp %20 : vector<32x1xf32>
    %cst_7 = arith.constant 1.000000e+00 : f32
    %22 = vector.broadcast %cst_7 : f32 to vector<32x1xf32>
    %23 = arith.subf %22, %21 : vector<32x1xf32>
    %cst_8 = arith.constant 0.000000e+00 : f32
    %24 = vector.broadcast %cst_8 : f32 to vector<32x1xf32>
    %25 = arith.maximumf %23, %24 : vector<32x1xf32>
    %26 = arith.mulf %25, %25 : vector<32x1xf32>
    %cst_9 = arith.constant 1.000000e+00 : f32
    %27 = vector.broadcast %cst_9 : f32 to vector<32x1xf32>
    %28 = arith.mulf %27, %26 : vector<32x1xf32>
    %29 = arith.mulf %28, %18 : vector<32x1xf32>
    %c0_10 = arith.constant 0 : index
    %c0_11 = arith.constant 0 : index
    %30 = vector.load %arg3[%c0_10, %c0_11] : memref<32x1xf32, #tpu.memory_space<vmem>>, vector<32x1xf32>
    tpu.vector_store %arg3[%c0_10, %c0_11], %29 {strides = array<i32>} : memref<32x1xf32, #tpu.memory_space<vmem>>, vector<32x1xf32>,
    return
  }
  func.func @transform_0(%arg0: i32) -> (i32, i32) {
    %c0_i32 = arith.constant 0 : i32
    %c0_i32_0 = arith.constant 0 : i32
    return %arg0, %c0_i32 : i32, i32
  }
  func.func @transform_1(%arg0: i32) -> (i32, i32) {
    %c0_i32 = arith.constant 0 : i32
    %c0_i32_0 = arith.constant 0 : i32
    return %arg0, %c0_i32 : i32, i32
  }
  func.func @transform_2(%arg0: i32) -> (i32, i32) {
    %c0_i32 = arith.constant 0 : i32
    %c0_i32_0 = arith.constant 0 : i32
    return %arg0, %c0_i32 : i32, i32
  }
}

</mosaic_0001>

<bundles_post_ra>
// kernel: tpu_custom_call.1
= control target key start
LH: loop header
LB: loop body
LE: loop exit
PB: predicated region body
PF: predicated region fallthrough
CT: control target
= control target key end

     0   :  { %s437_s9 = smov 0   ;;  %s495_s0 = inlined_call_operand.vmem [shape: f32[64,16], index: 0, kind: input, shape index: {}]   ;;  %s496_s1 = inlined_call_operand.vmem [shape: s32[64,1], index: 1, kind: input, shape index: {}]   ;;  %s497_s2 = inlined_call_operand.vmem [shape: f32[64,1], index: 2, kind: output, shape index: {}]  }
   0x1 LB: > { %s365_s10 = sadd.s32 4294967295, %s419_s9   ;;  %p369_p0 = scmp.ge.s32.totalorder %s419_s9, 1  ;;  %s419_s9 = sphi %s437_s9, %s12_s9  }
   0x2   : > { %p124_p1 = scmp.lt.s32.totalorder %s419_s9, 3 }
   0x4   : > { %p125_p2 = pnand %p369_p0, %p124_p1 }
   0x5   : > { %s370_s11 = sshll.u32 (!%p125_p2), %s365_s10, 2 }
   0x6   : > { %128 = sbr.rel (%p125_p2) target bundleno = 366 (0x16e), region = 28  ;;  %p152_p3 = scmp.lt.s32.totalorder (!%p125_p2), %s370_s11, 7 }
   0xb   : > { %v421_v0 = vmov 0   ;;  %s499_s11 = smov (!%p152_p3, %s370_s11), 7  ;;  %vm177_vm0 = vcmask 130048   ;;  %v226_v26 = vlaneseq  ;;  %vm292_vm5 = vcmask 7168  }
   0xc   : > { %388 = vset.pattern.permute.xlu1 %v421_v0  ;;  %387 = vset.pattern.permute.xlu0 %v421_v0  ;;  %s445_s12 = sshll.u32 %s499_s11, 3 }
   0xd   : > { %s155_s15 = scalar_lea.vmem %s495_s0, %s445_s12  ;;  %s161_s18 = scalar_lea.vmem %s496_s1, %s445_s12  ;;  %v227_v27 = vand.u32 127, %v226_v26 }
   0xe   : > { %v169_v1 = vld [vmem:[%s155_s15] sm:$0xff]  ;;  %v171_v2 = vld [vmem:[%s155_s15 + $0x10] sm:$0xff]  ;;  %v170_v3 = vld [vmem:[%s155_s15 + $0x8] sm:$0xff]  ;;  %s167_s21 = scalar_lea.vmem %s497_s2, %s445_s12 }
   0xf   : > { %v178_v4 = vsel %vm177_vm0, %v169_v1, -inf  ;;  %v184_v5 = vsel %vm177_vm0, %v171_v2, -inf  ;;  %v453_v6 = vld [vmem:[%s155_s15 + $0x18] sm:$0xff]  ;;  %v181_v7 = vsel %vm177_vm0, %v170_v3, -inf  ;;  %v174_v9 = vld [vmem:[%s161_s18 + $0x8] sm:$0xff]  ;;  %v175_v10 = vld [vmem:[%s161_s18 + $0x10] sm:$0xff] }
  0x10   : > { %179 = vmax.xlane.f32.xlu0 %v178_v4  ;;  %185 = vmax.xlane.f32.xlu1 %v184_v5  ;;  %v187_v8 = vsel %vm177_vm0, %v453_v6, -inf  ;;  %v173_v11 = vld [vmem:[%s161_s18] sm:$0xff]  ;;  %v176_v12 = vld [vmem:[%s161_s18 + $0x18] sm:$0xff] }
  0x14   : > { %182 = vmax.xlane.f32.xlu0 %v181_v7  ;;  %188 = vmax.xlane.f32.xlu1 %v187_v8 }
  0x25   : > { %232 = vperm.xlu1 %388, %v174_v9  }
  0x29   : > { %235 = vperm.xlu1 %388, %v175_v10  }
  0x2a   : > { %229 = vperm.xlu0 %387, %v173_v11  }
  0x2d   : > { %238 = vperm.xlu1 %388, %v176_v12  }
  0x99   : > { %v180_v13 = vpop.xlane.xlu0 %179  ;;  %v462_v14 = vpop.xlane.xlu1 %185 }
  0x9a   : > { %v190_v15 = vsub.f32 %v169_v1, %v180_v13  ;;  %v192_v16 = vsub.f32 %v171_v2, %v462_v14 }
  0x9c   : > { %v194_v17 = vmul.f32 1.442695, %v190_v15  ;;  %v198_v18 = vmul.f32 1.442695, %v192_v16 }
  0x9d   : > { %v465_v19 = vpop.xlane.xlu0 %182  ;;  %v467_v20 = vpop.xlane.xlu1 %188 }
  0x9e   : > { %389 = vpow2.f32 %v194_v17  ;;  %v191_v21 = vsub.f32 %v170_v3, %v465_v19  ;;  %v193_v22 = vsub.f32 %v453_v6, %v467_v20 }
  0x9f   : > { %391 = vpow2.f32 %v198_v18 }
  0xa0   : > { %v196_v23 = vmul.f32 1.442695, %v191_v21  ;;  %v200_v24 = vmul.f32 1.442695, %v193_v22 }
  0xa1   : > { %v233_v25 = vpop.permute.xlu1 %232 }
  0xa2   : > { %393 = vpow2.f32 %v196_v23  ;;  %vm241_vm3 = vcmp.eq.s32.totalorder %v227_v27, %v233_v25 }
  0xa3   : > { %395 = vpow2.f32 %v200_v24  ;;  %v245_v43 = vsel %vm241_vm3, %v170_v3, 0.0 }
  0xa4   : > { %v251_v44 = vsel %vm177_vm0, %v245_v43, 0.0 }
  0xa5   : > { %v236_v29 = vpop.permute.xlu1 %235  ;;  %v230_v32 = vpop.permute.xlu0 %229 }
  0xa6   : > { %vm242_vm1 = vcmp.eq.s32.totalorder %v227_v27, %v236_v29  ;;  %vm240_vm2 = vcmp.eq.s32.totalorder %v227_v27, %v230_v32 }
  0xa7   : > { %v246_v35 = vsel %vm242_vm1, %v171_v2, 0.0  ;;  %v244_v40 = vsel %vm240_vm2, %v169_v1, 0.0 }
  0xa8   : > { %v254_v39 = vsel %vm177_vm0, %v246_v35, 0.0  ;;  %v248_v41 = vsel %vm177_vm0, %v244_v40, 0.0 }
  0xa9   : > { %v239_v42 = vpop.permute.xlu1 %238 }
  0xaa   : > { %vm243_vm4 = vcmp.eq.s32.totalorder %v227_v27, %v239_v42 }
  0xab   : > { %v390_v28 = vpop.eup %389  ;;  %v247_v45 = vsel %vm243_vm4, %v453_v6, 0.0 }
  0xac   : > { %v392_v30 = vpop.eup %391  ;;  %v202_v31 = vsel %vm177_vm0, %v390_v28, 0.0  ;;  %v257_v46 = vsel %vm177_vm0, %v247_v45, 0.0 }
  0xad   : > { %203 = vadd.xlane.f32.xlu1 %v202_v31  ;;  %v208_v33 = vsel %vm177_vm0, %v392_v30, 0.0 }
  0xaf   : > { %v394_v34 = vpop.eup %393 }
  0xb0   : > { %v396_v36 = vpop.eup %395  ;;  %v205_v37 = vsel %vm177_vm0, %v394_v34, 0.0 }
  0xb1   : > { %209 = vadd.xlane.f32.xlu1 %v208_v33  ;;  %206 = vadd.xlane.f32.xlu0 %v205_v37  ;;  %v211_v38 = vsel %vm177_vm0, %v396_v36, 0.0 }
  0xb5   : > { %212 = vadd.xlane.f32.xlu1 %v211_v38  ;;  %255 = vadd.xlane.f32.xlu0 %v254_v39 }
  0xb9   : > { %249 = vadd.xlane.f32.xlu1 %v248_v41 }
  0xbd   : > { %252 = vadd.xlane.f32.xlu1 %v251_v44 }
  0xc1   : > { %258 = vadd.xlane.f32.xlu1 %v257_v46 }
 0x136   : > { %v204_v47 = vpop.xlane.xlu1 %203 }
 0x137   : > { %397 = vlog2.f32 %v204_v47 }
 0x13a   : > { %v210_v48 = vpop.xlane.xlu1 %209  ;;  %v207_v49 = vpop.xlane.xlu0 %206 }
 0x13b   : > { %399 = vlog2.f32 %v210_v48 }
 0x13c   : > { %401 = vlog2.f32 %v207_v49 }
 0x13e   : > { %v213_v50 = vpop.xlane.xlu1 %212  ;;  %v256_v1 = vpop.xlane.xlu0 %255 }
 0x13f   : > { %403 = vlog2.f32 %v213_v50 }
 0x142   : > { %v250_v52 = vpop.xlane.xlu1 %249 }
 0x144   : > { %v398_v51 = vpop.eup %397 }
 0x145   : > { %v215_v53 = vmul.f32 0.6931472, %v398_v51 }
 0x146   : > { %v253_v60 = vpop.xlane.xlu1 %252 }
 0x147   : > { %v222_v54 = vadd.f32 %v215_v53, %v180_v13 }
 0x148   : > { %v400_v55 = vpop.eup %399 }
 0x149   : > { %v402_v56 = vpop.eup %401  ;;  %v219_v57 = vmul.f32 0.6931472, %v400_v55  ;;  %v260_v58 = vsub.f32 %v222_v54, %v250_v52 }
 0x14a   : > { %v217_v59 = vmul.f32 0.6931472, %v402_v56  ;;  %v259_v9 = vpop.xlane.xlu1 %258 }
 0x14b   : > { %v264_v61 = vsub.f32 0.0, %v260_v58  ;;  %v224_v62 = vadd.f32 %v219_v57, %v462_v14 }
 0x14c   : > { %v404_v63 = vpop.eup %403  ;;  %v223_v0 = vadd.f32 %v217_v59, %v465_v19 }
 0x14d   : > { %v221_v2 = vmul.f32 0.6931472, %v404_v63  ;;  %v268_v3 = vmul.f32 1.442695, %v264_v61  ;;  %v262_v4 = vsub.f32 %v224_v62, %v256_v1 }
 0x14e   : > { %v261_v5 = vsub.f32 %v223_v0, %v253_v60 }
 0x14f   : > { %405 = vpow2.f32 %v268_v3  ;;  %v266_v6 = vsub.f32 0.0, %v262_v4  ;;  %v225_v7 = vadd.f32 %v221_v2, %v467_v20 }
 0x150   : > { %v265_v8 = vsub.f32 0.0, %v261_v5 }
 0x151   : > { %v272_v10 = vmul.f32 1.442695, %v266_v6  ;;  %v263_v11 = vsub.f32 %v225_v7, %v259_v9 }
 0x152   : > { %v270_v12 = vmul.f32 1.442695, %v265_v8 }
 0x153   : > { %407 = vpow2.f32 %v272_v10  ;;  %v267_v13 = vsub.f32 0.0, %v263_v11 }
 0x154   : > { %409 = vpow2.f32 %v270_v12 }
 0x155   : > { %v274_v14 = vmul.f32 1.442695, %v267_v13 }
 0x157   : > { %411 = vpow2.f32 %v274_v14 }
 0x15c   : > { %v406_v15 = vpop.eup %405 }
 0x15d   : > { %v276_v16 = vsub.f32 1.0, %v406_v15 }
 0x15f   : > { %v280_v17 = vmax.f32 %v276_v16, 0.0 }
 0x160   : > { %v408_v18 = vpop.eup %407 }
 0x161   : > { %v410_v19 = vpop.eup %409  ;;  %v284_v21 = vmul.f32 %v280_v17, %v280_v17  ;;  %v278_v22 = vsub.f32 1.0, %v408_v18 }
 0x162   : > { %v277_v20 = vsub.f32 1.0, %v410_v19 }
 0x163   : > { %v288_v23 = vmul.f32 %v284_v21, %v260_v58  ;;  %v282_v24 = vmax.f32 %v278_v22, 0.0 }
 0x164   : > { %v412_v25 = vpop.eup %411  ;;  %v281_v26 = vmax.f32 %v277_v20, 0.0 }
 0x165   : > { %293 = vst.msk [vmem:[%s167_s21] sm:$0xff] %vm292_vm5, %v288_v23  ;;  %v286_v27 = vmul.f32 %v282_v24, %v282_v24  ;;  %v279_v28 = vsub.f32 1.0, %v412_v25 }
 0x166   : > { %v285_v29 = vmul.f32 %v281_v26, %v281_v26 }
 0x167   : > { %v290_v30 = vmul.f32 %v286_v27, %v262_v4  ;;  %v283_v31 = vmax.f32 %v279_v28, 0.0 }
 0x168   : > { %v289_v32 = vmul.f32 %v285_v29, %v261_v5 }
 0x169   : > { %v287_v33 = vmul.f32 %v283_v31, %v283_v31  ;;  %295 = vst.msk [vmem:[%s167_s21 + $0x10] sm:$0xff] %vm292_vm5, %v290_v30 }
 0x16a   : > { %294 = vst.msk [vmem:[%s167_s21 + $0x8] sm:$0xff] %vm292_vm5, %v289_v32 }
 0x16b   : > { %v291_v34 = vmul.f32 %v287_v33, %v263_v11 }
 0x16d   : > { %296 = vst.msk [vmem:[%s167_s21 + $0x18] sm:$0xff] %vm292_vm5, %v291_v34 }
 0x16e PF: > { %s12_s9 = sadd.s32 1, %s419_s9  }
 0x16f   : > { %p9_p4 = scmp.ge.s32.totalorder %s12_s9, 4  }
 0x171   :  { %11 = sbr.rel (!%p9_p4) target bundleno = 1 (0x1), region = 61 }

</bundles_post_ra>
